<compile_context>
chip_gen: v7x
topology: tpu7x:2x2x1
jax: 0.10.0
libtpu: 0.0.40
codegen_flags: <defaults>
</compile_context>

<pallas_src>
import functools

import jax
import jax.numpy as jnp
from jax.experimental import pallas as pl
from jax.experimental.pallas import tpu as pltpu


def _pick_hw_tile(hw, c, elem_bytes, max_block_bytes=2 << 20):
    """Largest multiple-of-128 divisor of hw whose (c, tile) block fits budget."""
    if hw % 128 != 0:
        return hw  # full extent (allowed when block dim equals array dim)
    best = 128
    t = 128
    while t <= hw:
        if hw % t == 0 and c * t * elem_bytes <= max_block_bytes:
            best = t
        t += 128
    return best


def _gate_kernel(x_ref, t_ref,
                 wc_t_ref, bc_ref,    # conv1x1 weight (Cin, Cout) + bias row
                 wt_t_ref, bt_ref,    # text linear weight (D, C) + bias row
                 w1_t_ref, b1_ref,    # fc1 weight (C, Cr) + bias row
                 w2_t_ref, b2_ref,    # fc2 weight (Cr, C) + bias row
                 w_ref,               # out: (1, C) channel gate for this batch
                 acc_ref,             # scratch: (C, 1) running spatial sum
                 *, inv_hw):
    s = pl.program_id(1)

    @pl.when(s == 0)
    def _():
        acc_ref[...] = jnp.zeros_like(acc_ref)

    # partial spatial sum over this (C, HW_TILE) tile -> (C, 1)  (lane reduce)
    acc_ref[...] += jnp.sum(x_ref[...].astype(jnp.float32), axis=-1, keepdims=True)

    @pl.when(s == pl.num_programs(1) - 1)
    def _():
        pooled_col = acc_ref[...] * inv_hw                                   # (C, 1)
        # fused conv1x1 + global-avg-pool (mean commutes with the linear map):
        # pooled_proj[o] = sum_i wc[o, i] * pooled[i] + bc[o]
        pooled_proj = jnp.sum(wc_t_ref[...] * pooled_col,
                              axis=0, keepdims=True) + bc_ref[...]           # (1, C)
        tproj = jnp.dot(t_ref[...].astype(jnp.float32), wt_t_ref[...],
                        preferred_element_type=jnp.float32) + bt_ref[...]    # (1, C)
        fusion = pooled_proj + tproj
        h = jnp.maximum(
            jnp.dot(fusion, w1_t_ref[...],
                    preferred_element_type=jnp.float32) + b1_ref[...], 0.0)  # (1, Cr)
        logits = jnp.dot(h, w2_t_ref[...],
                         preferred_element_type=jnp.float32) + b2_ref[...]   # (1, C)
        w_ref[...] = jax.nn.sigmoid(logits).astype(w_ref.dtype)


def _scale_kernel(x_ref, w_ref, o_ref):
    # x_ref: (C, HW_TILE); w_ref: (C, 1) broadcast along lanes -> lane-dense store
    o_ref[...] = (x_ref[...] * w_ref[...]).astype(o_ref.dtype)


def channel_wise_attention(image_feat, text_feat, params):
    """image_feat: (B, C, H, W); text_feat: (B, D)."""
    B, C, H, W = image_feat.shape
    D = text_feat.shape[1]
    HW = H * W
    Cr = params["w1"].shape[0]

    # NCHW stays NCHW: this is a pure reshape (no transpose / no extra HBM pass).
    x = image_feat.reshape(B, C, HW)
    t = text_feat.reshape(B, 1, D)

    # pre-transpose weights to the orientation the kernel uses
    wc_t = jnp.transpose(params["wc"])          # (Cin, Cout)
    wt_t = jnp.transpose(params["wt"])          # (D, C)
    w1_t = jnp.transpose(params["w1"])          # (C, Cr)
    w2_t = jnp.transpose(params["w2"])          # (Cr, C)
    bc = params["bc"].reshape(1, C)
    bt = params["bt"].reshape(1, C)
    b1 = params["b1"].reshape(1, Cr)
    b2 = params["b2"].reshape(1, C)

    elem_bytes = jnp.dtype(image_feat.dtype).itemsize
    hw_tile = _pick_hw_tile(HW, C, elem_bytes)
    n_hw = HW // hw_tile

    full = lambda shape: pl.BlockSpec(shape, lambda b, s: (0,) * len(shape))

    # ---- pass 1: per-batch channel gate (B, 1, C) ----------------------------
    gate = pl.pallas_call(
        functools.partial(_gate_kernel, inv_hw=1.0 / HW),
        out_shape=jax.ShapeDtypeStruct((B, 1, C), jnp.float32),
        grid_spec=pltpu.PrefetchScalarGridSpec(
            num_scalar_prefetch=0,
            grid=(B, n_hw),
            in_specs=[
                pl.BlockSpec((None, C, hw_tile), lambda b, s: (b, 0, s)),  # x tile
                pl.BlockSpec((None, 1, D), lambda b, s: (b, 0, 0)),        # text row
                full((C, C)),  full((1, C)),                               # conv1x1
                full((D, C)),  full((1, C)),                               # text proj
                full((C, Cr)), full((1, Cr)),                              # fc1
                full((Cr, C)), full((1, C)),                               # fc2
            ],
            out_specs=pl.BlockSpec((None, 1, C), lambda b, s: (b, 0, 0)),
            scratch_shapes=[pltpu.VMEM((C, 1), jnp.float32)],
        ),
        compiler_params=pltpu.CompilerParams(
            dimension_semantics=("parallel", "arbitrary")),
    )(x, t, wc_t, bc, wt_t, bt, w1_t, b1, w2_t, b2)

    # (B, 1, C) -> (B, C, 1): pure reshape (same linear order), tiny tensor.
    w_col = gate.reshape(B, C, 1)

    # ---- pass 2: lane-dense elementwise channel scale -------------------------
    out = pl.pallas_call(
        _scale_kernel,
        out_shape=jax.ShapeDtypeStruct((B, C, HW), image_feat.dtype),
        grid_spec=pltpu.PrefetchScalarGridSpec(
            num_scalar_prefetch=0,
            grid=(B, n_hw),
            in_specs=[
                pl.BlockSpec((None, C, hw_tile), lambda b, s: (b, 0, s)),  # x tile
                pl.BlockSpec((None, C, 1), lambda b, s: (b, 0, 0)),        # gate col
            ],
            out_specs=pl.BlockSpec((None, C, hw_tile), lambda b, s: (b, 0, s)),
        ),
        compiler_params=pltpu.CompilerParams(
            dimension_semantics=("parallel", "parallel")),
    )(x, w_col)

    return out.reshape(B, C, H, W)


def _reference(image_feat, text_feat, params):
    """Pure-JAX reference mirroring the PyTorch forward (original op order)."""
    proj = (jnp.einsum("bchw,oc->bohw", image_feat, params["wc"])
            + params["bc"][None, :, None, None])
    pooled = jnp.mean(proj, axis=(2, 3))                        # (B, C)
    tproj = text_feat @ params["wt"].T + params["bt"]           # (B, C)
    fusion = pooled + tproj
    h = jnp.maximum(fusion @ params["w1"].T + params["b1"], 0.0)
    w = jax.nn.sigmoid(h @ params["w2"].T + params["b2"])       # (B, C)
    return image_feat * w[:, :, None, None]


if __name__ == "__main__":
    B, C, H, W = 2, 32, 16, 16
    D = 16
    reduction_ratio = 16
    Cr = C // reduction_ratio

    key = jax.random.PRNGKey(0)
    k = jax.random.split(key, 10)

    image_feat = jax.random.normal(k[0], (B, C, H, W), jnp.float32)
    text_feat = jax.random.normal(k[1], (B, D), jnp.float32)

    # deterministic synthetic parameters (PyTorch (out, in) convention)
    params = {
        "wc": jax.random.normal(k[2], (C, C), jnp.float32) * 0.1,   # Conv2d(C,C,1)
        "bc": jax.random.normal(k[3], (C,), jnp.float32) * 0.1,
        "wt": jax.random.normal(k[4], (C, D), jnp.float32) * 0.1,   # Linear(D, C)
        "bt": jax.random.normal(k[5], (C,), jnp.float32) * 0.1,
        "w1": jax.random.normal(k[6], (Cr, C), jnp.float32) * 0.1,  # Linear(C, C//r)
        "b1": jax.random.normal(k[7], (Cr,), jnp.float32) * 0.1,
        "w2": jax.random.normal(k[8], (C, Cr), jnp.float32) * 0.1,  # Linear(C//r, C)
        "b2": jax.random.normal(k[9], (C,), jnp.float32) * 0.1,
    }

    out = channel_wise_attention(image_feat, text_feat, params)
    out = jax.block_until_ready(out)

    ref = _reference(image_feat, text_feat, params)
    assert out.shape == (B, C, H, W)
    assert jnp.allclose(out, ref, rtol=1e-4, atol=1e-4), "mismatch vs reference"

    print("KERNEL_OK")
</pallas_src>

<mosaic_0001>
module attributes {stable_mosaic.version = 11 : i64} {
  func.func @_gate_kernel(%arg0: i32, %arg1: i32, %arg2: memref<1x32x256xf32, #tpu.memory_space<vmem>>, %arg3: memref<1x1x16xf32, #tpu.memory_space<vmem>>, %arg4: memref<32x32xf32, #tpu.memory_space<vmem>>, %arg5: memref<1x32xf32, #tpu.memory_space<vmem>>, %arg6: memref<16x32xf32, #tpu.memory_space<vmem>>, %arg7: memref<1x32xf32, #tpu.memory_space<vmem>>, %arg8: memref<32x2xf32, #tpu.memory_space<vmem>>, %arg9: memref<1x2xf32, #tpu.memory_space<vmem>>, %arg10: memref<2x32xf32, #tpu.memory_space<vmem>>, %arg11: memref<1x32xf32, #tpu.memory_space<vmem>>, %arg12: memref<1x1x32xf32, #tpu.memory_space<vmem>>, %arg13: memref<32x1xf32, #tpu.memory_space<vmem>>) attributes {dimension_semantics = [#tpu.dimension_semantics<parallel>, #tpu.dimension_semantics<arbitrary>], iteration_bounds = array<i64: 2, 1>, scalar_prefetch = 0 : i64, scratch_operands = 1 : i64, tpu.core_type = #tpu.core_type<tc>, window_params = [{transform_indices = @transform_0, window_bounds = array<i64: 1, 32, 256>}, {transform_indices = @transform_1, window_bounds = array<i64: 1, 1, 16>}, {pipeline_mode = #tpu.pipeline_mode<synchronous>, transform_indices = @transform_2, window_bounds = array<i64: 32, 32>}, {pipeline_mode = #tpu.pipeline_mode<synchronous>, transform_indices = @transform_3, window_bounds = array<i64: 1, 32>}, {pipeline_mode = #tpu.pipeline_mode<synchronous>, transform_indices = @transform_4, window_bounds = array<i64: 16, 32>}, {pipeline_mode = #tpu.pipeline_mode<synchronous>, transform_indices = @transform_5, window_bounds = array<i64: 1, 32>}, {pipeline_mode = #tpu.pipeline_mode<synchronous>, transform_indices = @transform_6, window_bounds = array<i64: 32, 2>}, {pipeline_mode = #tpu.pipeline_mode<synchronous>, transform_indices = @transform_7, window_bounds = array<i64: 1, 2>}, {pipeline_mode = #tpu.pipeline_mode<synchronous>, transform_indices = @transform_8, window_bounds = array<i64: 2, 32>}, {pipeline_mode = #tpu.pipeline_mode<synchronous>, transform_indices = @transform_9, window_bounds = array<i64: 1, 32>}, {transform_indices = @transform_10, window_bounds = array<i64: 1, 1, 32>}]} {
    %c0_i32 = arith.constant 0 : i32
    %0 = arith.cmpi eq, %arg1, %c0_i32 : i32
    %1 = arith.extui %0 : i1 to i32
    %c0_i32_0 = arith.constant 0 : i32
    %2 = arith.cmpi ne, %1, %c0_i32_0 : i32
    scf.if %2 {
      %cst_9 = arith.constant 0.000000e+00 : f32
      %13 = vector.broadcast %cst_9 : f32 to vector<32x1xf32>
      %c0_10 = arith.constant 0 : index
      %c0_11 = arith.constant 0 : index
      %14 = vector.load %arg13[%c0_10, %c0_11] : memref<32x1xf32, #tpu.memory_space<vmem>>, vector<32x1xf32>
      tpu.vector_store %arg13[%c0_10, %c0_11], %13 {strides = array<i32>} : memref<32x1xf32, #tpu.memory_space<vmem>>, vector<32x1xf32>,
    } else {
    }
    %c0 = arith.constant 0 : index
    %c0_1 = arith.constant 0 : index
    %3 = vector.load %arg13[%c0, %c0_1] : memref<32x1xf32, #tpu.memory_space<vmem>>, vector<32x1xf32>
    %c0_2 = arith.constant 0 : index
    %c0_3 = arith.constant 0 : index
    %c0_4 = arith.constant 0 : index
    %4 = vector.load %arg2[%c0_2, %c0_3, %c0_4] : memref<1x32x256xf32, #tpu.memory_space<vmem>>, vector<1x32x256xf32>
    %5 = vector.shape_cast %4 : vector<1x32x256xf32> to vector<32x256xf32>
    %cst = arith.constant dense<0.000000e+00> : vector<32xf32>
    %6 = vector.multi_reduction <add>, %5, %cst [1] : vector<32x256xf32> to vector<32xf32>
    %7 = vector.shape_cast %6 : vector<32xf32> to vector<32x1xf32>
    %8 = arith.addf %3, %7 : vector<32x1xf32>
    %c0_5 = arith.constant 0 : index
    %c0_6 = arith.constant 0 : index
    %9 = vector.load %arg13[%c0_5, %c0_6] : memref<32x1xf32, #tpu.memory_space<vmem>>, vector<32x1xf32>
    tpu.vector_store %arg13[%c0_5, %c0_6], %8 {strides = array<i32>} : memref<32x1xf32, #tpu.memory_space<vmem>>, vector<32x1xf32>,
    %c0_i32_7 = arith.constant 0 : i32
    %10 = arith.cmpi eq, %arg1, %c0_i32_7 : i32
    %11 = arith.extui %10 : i1 to i32
    %c0_i32_8 = arith.constant 0 : i32
    %12 = arith.cmpi ne, %11, %c0_i32_8 : i32
    scf.if %12 {
      %c0_9 = arith.constant 0 : index
      %c0_10 = arith.constant 0 : index
      %13 = vector.load %arg13[%c0_9, %c0_10] : memref<32x1xf32, #tpu.memory_space<vmem>>, vector<32x1xf32>
      %cst_11 = arith.constant 3.906250e-03 : f32
      %14 = vector.broadcast %cst_11 : f32 to vector<32x1xf32>
      %15 = arith.mulf %13, %14 : vector<32x1xf32>
      %c0_12 = arith.constant 0 : index
      %c0_13 = arith.constant 0 : index
      %16 = vector.load %arg4[%c0_12, %c0_13] : memref<32x32xf32, #tpu.memory_space<vmem>>, vector<32x32xf32>
      %17 = vector.broadcast %15 : vector<32x1xf32> to vector<32x32xf32>
      %18 = arith.mulf %16, %17 : vector<32x32xf32>
      %cst_14 = arith.constant dense<0.000000e+00> : vector<32xf32>
      %19 = vector.multi_reduction <add>, %18, %cst_14 [0] : vector<32x32xf32> to vector<32xf32>
      %20 = vector.shape_cast %19 : vector<32xf32> to vector<1x32xf32>
      %c0_15 = arith.constant 0 : index
      %c0_16 = arith.constant 0 : index
      %21 = vector.load %arg5[%c0_15, %c0_16] : memref<1x32xf32, #tpu.memory_space<vmem>>, vector<1x32xf32>
      %22 = arith.addf %20, %21 : vector<1x32xf32>
      %c0_17 = arith.constant 0 : index
      %c0_18 = arith.constant 0 : index
      %c0_19 = arith.constant 0 : index
      %23 = vector.load %arg3[%c0_17, %c0_18, %c0_19] : memref<1x1x16xf32, #tpu.memory_space<vmem>>, vector<1x1x16xf32>
      %24 = vector.shape_cast %23 : vector<1x1x16xf32> to vector<1x16xf32>
      %c0_20 = arith.constant 0 : index
      %c0_21 = arith.constant 0 : index
      %25 = vector.load %arg6[%c0_20, %c0_21] : memref<16x32xf32, #tpu.memory_space<vmem>>, vector<16x32xf32>
      %cst_22 = arith.constant dense<0.000000e+00> : vector<1x32xf32>
      %26 = tpu.matmul %24, %25, %cst_22 {dimension_numbers = #tpu.dot_dimension_numbers<[1], [0], [0], [1], [0, 0, 1, 1], [], []>} : vector<1x16xf32>, vector<16x32xf32>, vector<1x32xf32> -> vector<1x32xf32>
      %c0_23 = arith.constant 0 : index
      %c0_24 = arith.constant 0 : index
      %27 = vector.load %arg7[%c0_23, %c0_24] : memref<1x32xf32, #tpu.memory_space<vmem>>, vector<1x32xf32>
      %28 = arith.addf %26, %27 : vector<1x32xf32>
      %29 = arith.addf %22, %28 : vector<1x32xf32>
      %c0_25 = arith.constant 0 : index
      %c0_26 = arith.constant 0 : index
      %30 = vector.load %arg8[%c0_25, %c0_26] : memref<32x2xf32, #tpu.memory_space<vmem>>, vector<32x2xf32>
      %cst_27 = arith.constant dense<0.000000e+00> : vector<1x2xf32>
      %31 = tpu.matmul %29, %30, %cst_27 {dimension_numbers = #tpu.dot_dimension_numbers<[1], [0], [0], [1], [0, 0, 1, 1], [], []>} : vector<1x32xf32>, vector<32x2xf32>, vector<1x2xf32> -> vector<1x2xf32>
      %c0_28 = arith.constant 0 : index
      %c0_29 = arith.constant 0 : index
      %32 = vector.load %arg9[%c0_28, %c0_29] : memref<1x2xf32, #tpu.memory_space<vmem>>, vector<1x2xf32>
      %33 = arith.addf %31, %32 : vector<1x2xf32>
      %cst_30 = arith.constant 0.000000e+00 : f32
      %34 = vector.broadcast %cst_30 : f32 to vector<1x2xf32>
      %35 = arith.maximumf %33, %34 : vector<1x2xf32>
      %c0_31 = arith.constant 0 : index
      %c0_32 = arith.constant 0 : index
      %36 = vector.load %arg10[%c0_31, %c0_32] : memref<2x32xf32, #tpu.memory_space<vmem>>, vector<2x32xf32>
      %cst_33 = arith.constant dense<0.000000e+00> : vector<1x32xf32>
      %37 = tpu.matmul %35, %36, %cst_33 {dimension_numbers = #tpu.dot_dimension_numbers<[1], [0], [0], [1], [0, 0, 1, 1], [], []>} : vector<1x2xf32>, vector<2x32xf32>, vector<1x32xf32> -> vector<1x32xf32>
      %c0_34 = arith.constant 0 : index
      %c0_35 = arith.constant 0 : index
      %38 = vector.load %arg11[%c0_34, %c0_35] : memref<1x32xf32, #tpu.memory_space<vmem>>, vector<1x32xf32>
      %39 = arith.addf %37, %38 : vector<1x32xf32>
      %40 = arith.negf %39 : vector<1x32xf32>
      %41 = math.exp %40 : vector<1x32xf32>
      %cst_36 = arith.constant 1.000000e+00 : f32
      %42 = vector.broadcast %cst_36 : f32 to vector<1x32xf32>
      %43 = arith.addf %42, %41 : vector<1x32xf32>
      %44 = arith.divf %42, %43 : vector<1x32xf32>
      %c0_37 = arith.constant 0 : index
      %c0_38 = arith.constant 0 : index
      %c0_39 = arith.constant 0 : index
      %45 = vector.load %arg12[%c0_37, %c0_38, %c0_39] : memref<1x1x32xf32, #tpu.memory_space<vmem>>, vector<1x1x32xf32>
      %46 = vector.shape_cast %45 : vector<1x1x32xf32> to vector<1x32xf32>
      %47 = vector.shape_cast %44 : vector<1x32xf32> to vector<1x1x32xf32>
      tpu.vector_store %arg12[%c0_37, %c0_38, %c0_39], %47 {strides = array<i32>} : memref<1x1x32xf32, #tpu.memory_space<vmem>>, vector<1x1x32xf32>,
    } else {
    }
    return
  }
  func.func @transform_0(%arg0: i32, %arg1: i32) -> (i32, i32, i32) {
    %c0_i32 = arith.constant 0 : i32
    %c0_i32_0 = arith.constant 0 : i32
    return %arg0, %c0_i32, %arg1 : i32, i32, i32
  }
  func.func @transform_1(%arg0: i32, %arg1: i32) -> (i32, i32, i32) {
    %c0_i32 = arith.constant 0 : i32
    %c0_i32_0 = arith.constant 0 : i32
    %c0_i32_1 = arith.constant 0 : i32
    return %arg0, %c0_i32, %c0_i32_0 : i32, i32, i32
  }
  func.func @transform_2(%arg0: i32, %arg1: i32) -> (i32, i32) {
    %c0_i32 = arith.constant 0 : i32
    %c0_i32_0 = arith.constant 0 : i32
    %c0_i32_1 = arith.constant 0 : i32
    return %c0_i32, %c0_i32_0 : i32, i32
  }
  func.func @transform_3(%arg0: i32, %arg1: i32) -> (i32, i32) {
    %c0_i32 = arith.constant 0 : i32
    %c0_i32_0 = arith.constant 0 : i32
    %c0_i32_1 = arith.constant 0 : i32
    return %c0_i32, %c0_i32_0 : i32, i32
  }
  func.func @transform_4(%arg0: i32, %arg1: i32) -> (i32, i32) {
    %c0_i32 = arith.constant 0 : i32
    %c0_i32_0 = arith.constant 0 : i32
    %c0_i32_1 = arith.constant 0 : i32
    return %c0_i32, %c0_i32_0 : i32, i32
  }
  func.func @transform_5(%arg0: i32, %arg1: i32) -> (i32, i32) {
    %c0_i32 = arith.constant 0 : i32
    %c0_i32_0 = arith.constant 0 : i32
    %c0_i32_1 = arith.constant 0 : i32
    return %c0_i32, %c0_i32_0 : i32, i32
  }
  func.func @transform_6(%arg0: i32, %arg1: i32) -> (i32, i32) {
    %c0_i32 = arith.constant 0 : i32
    %c0_i32_0 = arith.constant 0 : i32
    %c0_i32_1 = arith.constant 0 : i32
    return %c0_i32, %c0_i32_0 : i32, i32
  }
  func.func @transform_7(%arg0: i32, %arg1: i32) -> (i32, i32) {
    %c0_i32 = arith.constant 0 : i32
    %c0_i32_0 = arith.constant 0 : i32
    %c0_i32_1 = arith.constant 0 : i32
    return %c0_i32, %c0_i32_0 : i32, i32
  }
  func.func @transform_8(%arg0: i32, %arg1: i32) -> (i32, i32) {
    %c0_i32 = arith.constant 0 : i32
    %c0_i32_0 = arith.constant 0 : i32
    %c0_i32_1 = arith.constant 0 : i32
    return %c0_i32, %c0_i32_0 : i32, i32
  }
  func.func @transform_9(%arg0: i32, %arg1: i32) -> (i32, i32) {
    %c0_i32 = arith.constant 0 : i32
    %c0_i32_0 = arith.constant 0 : i32
    %c0_i32_1 = arith.constant 0 : i32
    return %c0_i32, %c0_i32_0 : i32, i32
  }
  func.func @transform_10(%arg0: i32, %arg1: i32) -> (i32, i32, i32) {
    %c0_i32 = arith.constant 0 : i32
    %c0_i32_0 = arith.constant 0 : i32
    %c0_i32_1 = arith.constant 0 : i32
    return %arg0, %c0_i32, %c0_i32_0 : i32, i32, i32
  }
}

</mosaic_0001>

<bundles_post_ra>
// kernel: tpu_custom_call.1
= control target key start
LH: loop header
LB: loop body
LE: loop exit
PB: predicated region body
PF: predicated region fallthrough
CT: control target
= control target key end

     0   :  { %s1726_s0 = inlined_call_operand.hbm [shape: f32[2,32,256], index: 0, kind: input, shape index: {}]   ;;  %s1727_s1 = inlined_call_operand.hbm [shape: f32[2,1,16], index: 1, kind: input, shape index: {}]   ;;  %s1728_s2 = inlined_call_operand.vmem [shape: f32[32,32], index: 2, kind: input, shape index: {}]   ;;  %s1729_s3 = inlined_call_operand.hbm [shape: f32[1,32], index: 3, kind: input, shape index: {}]   ;;  %s1730_s4 = inlined_call_operand.vmem [shape: f32[16,32], index: 4, kind: input, shape index: {}]   ;;  %s1731_s5 = inlined_call_operand.hbm [shape: f32[1,32], index: 5, kind: input, shape index: {}]   ;;  %s1732_s6 = inlined_call_operand.vmem [shape: f32[32,2], index: 6, kind: input, shape index: {}]   ;;  %s1733_s7 = inlined_call_operand.vmem [shape: f32[1,2], index: 7, kind: input, shape index: {}]   ;;  %s1734_s8 = inlined_call_operand.vmem [shape: f32[2,32], index: 8, kind: input, shape index: {}]   ;;  %s1735_s9 = inlined_call_operand.vmem [shape: f32[1,32], index: 9, kind: input, shape index: {}]   ;;  %s1736_s10 = inlined_call_operand.hbm [shape: f32[2,1,32], index: 10, kind: output, shape index: {}]  }
   0x1   :  { %1748 = sst [smem:[#allocation22_spill]] %s1726_s0 }
   0x2   :  { %1749 = sst [smem:[#allocation23_spill]] %s1729_s3 }
   0x3   :  { %1750 = sst [smem:[#allocation24_spill]] %s1731_s5 }
   0x4   :  { %1751 = sst [smem:[#allocation25_spill]] %s1736_s10 }
   0x5   :  { %15 = vsyncpa [#allocation4], 0 }
   0x6   :  { %17 = vsyncpa [#allocation4 + $0x1], 0 }
   0x7   :  { %18 = vsyncpa [#allocation7], 0 }
   0x8   :  { %20 = vsyncpa [#allocation7 + $0x1], 0 }
   0x9   :  { %21 = vsyncpa [#allocation10], 0 }
   0xa   :  { %22 = vsyncpa [#allocation5], 0 }
   0xb   :  { %24 = vsyncpa [#allocation5 + $0x1], 0  ;;  %s1368_s13 = smov 0   ;;  %s1370_s14 = smov 0  }
   0xc   :  { %s1372_s15 = smov 0   ;;  %s1374_s16 = smov 0  }
   0xd   :  { %s1376_s17 = smov 0   ;;  %s1378_s18 = smov 0  }
   0xe LB: > { %1752 = sst [smem:[#allocation17_spill]] %s1280_s13  ;;  %s1399_s19 = sadd.s32 4294967295, %s1300_s18   ;;  %s1300_s18 = sphi %s1378_s18, %s30_s18   ;;  %s1296_s17 = sphi %s1376_s17, %s1788_s17   ;;  %s1292_s16 = sphi %s1374_s16, %s1787_s16   ;;  %s1288_s15 = sphi %s1372_s15, %s1786_s15   ;;  %s1284_s14 = sphi %s1370_s14, %s1785_s14   ;;  %s1280_s13 = sphi %s1368_s13, %s1784_s13  }
   0xf   : > { %s926_s20 = sadd.s32 4294967294, %s1300_s18   ;;  %p58_p0 = scmp.ne.s32.totalorder %s1288_s15, %s1284_s14 }
  0x10   : > { %p59_p1 = scmp.eq.s32.totalorder %s1300_s18, 0  ;;  %p64_p2 = scmp.ne.s32.totalorder %s1284_s14, %s1280_s13 }
  0x11   : > { %p1740_p3 = scmp.eq.s32.totalorder %s1399_s19, 0  ;;  %p282_p4 = scmp.eq.s32.totalorder %s1399_s19, 1 }
  0x12   : > { %p1410_p5 = por %p59_p1, %p58_p0  ;;  %p288_p6 = scmp.eq.s32.totalorder %s926_s20, 1 }
  0x13   : > { %p1416_p7 = por %p1740_p3, %p64_p2  ;;  %p1420_p8 = por %p282_p4, %p58_p0 }
  0x14   : > { %p1424_p9 = por %p288_p6, %p64_p2  ;;  %p927_p10 = scmp.ge.s32.totalorder %s1300_s18, 1 }
  0x15   : > { %s1754_s23 = scalar_select %p1416_p7, 1, 0 }
  0x16   : > { %s1755_s24 = scalar_select %p1420_p8, 1, 0 }
  0x17   : > { %s1757_s25 = scalar_select %p1424_p9, 1, 0 }
  0x18   : > { %1756 = sst [smem:[#allocation18_spill]] %s1755_s24  ;;  %p295_p11 = scmp.lt.s32.totalorder %s1300_s18, 3 }
  0x19   : > { %1758 = sst [smem:[#allocation19_spill]] %s1757_s25  ;;  %s1302_s27 = smov [#allocation8]  }
  0x1a   : > { %p1431_p13 = pnand %p927_p10, %p295_p11  ;;  %s311_s28 = sshll.u32 %s1302_s27, 4  ;;  %s312_s28 = int_to_ptr.vmem [resolvable:$true] %s311_s28 }
  0x1b   : > { %p1024_p1 = scmp.lt.s32.totalorder %s1300_s18, 2  ;;  %s1303_s30 = smov [#allocation9]  }
  0x1c   : > { %s1759_s26 = scalar_select %p1431_p13, 1, 0 }
  0x1d   : > { %p1004_p0 = pneg %p1431_p13  ;;  %p1440_p4 = pnand %p1024_p1, %p1410_p5 }
  0x1e   : > { %s325_s11 = sshll.u32 %s1303_s30, 4  ;;  %s1762_s3 = sld [smem:[#allocation23_spill]]  ;;  %s1450_s11 = int_to_ptr.vmem [resolvable:$true] %s325_s11 }
  0x1f   : > { %s1760_s29 = scalar_select %p1440_p4, 1, 0 }
  0x20   : > { %p1446_p2 = pnand %p1004_p0, %p1740_p3 }
  0x22   : > { %p1092_p6 = pneg %p1446_p2 }
  0x24   : > { %s1090_s21 = scalar_lea.hbm %s1762_s3, 16 }
  0x25   : > { %p1091_p5 = scmp.ne.s32.totalorder %s1762_s3, %s1090_s21  ;;  %p1097_p1 = scmp.lt.u32.totalorder %s1090_s21, %s1762_s3 }
  0x27   : > { %p1093_p10 = pnand %p1092_p6, %p1091_p5 }
  0x29   : > { %p1094_p11 = pneg %p1093_p10 }
  0x2b   : > { %p1099_p0 = pnand %p1097_p1, %p1094_p11 }
  0x2d   : > { %1102 = shalt.err (!%p1099_p0)
}
  0x2e   : > { %s1103_s10 = scalar_lea.vmem %s312_s28, 16  ;;  %s1110_s25 = scalar_lea.vmem %s312_s28, 32 }
  0x2f   : > { %p1104_p12 = scmp.ne.s32.totalorder %s312_s28, %s1103_s10  ;;  %p1111_p8 = scmp.lt.s32.totalorder %s312_s28, %s312_s28 }
  0x30   : > { %p1112_p7 = scmp.lt.s32.totalorder %s1110_s25, %s1103_s10 }
  0x31   : > { %p1106_p3 = pnand %p1104_p12, %p1092_p6 }
  0x32   : > { %p1113_p13 = por %p1112_p7, %p1111_p8 }
  0x33   : > { %p1107_p9 = pneg %p1106_p3 }
  0x35   : > { %p1114_p4 = pnand %p1113_p13, %p1107_p9 }
  0x37   : > { %1117 = shalt.err (!%p1114_p4)
}
  0x38   : > { %1007 = dma.hbm_to_vmem [thread:$0]  (!%p1446_p2), %s1762_s3, 16, %s312_s28, [#allocation7]  }
  0x39   : > { %s1763_s5 = sld [smem:[#allocation24_spill]] }
  0x3f   : > { %s1118_s22 = scalar_lea.hbm %s1763_s5, 16 }
  0x40   : > { %p1119_p3 = scmp.ne.s32.totalorder %s1763_s5, %s1118_s22  ;;  %p1125_p9 = scmp.lt.u32.totalorder %s1118_s22, %s1763_s5 }
  0x42   : > { %p1121_p7 = pnand %p1119_p3, %p1092_p6 }
  0x44   : > { %p1122_p8 = pneg %p1121_p7 }
  0x46   : > { %p1127_p12 = pnand %p1125_p9, %p1122_p8 }
  0x48   : > { %1130 = shalt.err (!%p1127_p12)
}
  0x49   : > { %s1131_s28 = scalar_lea.vmem %s1450_s11, 16  ;;  %s1138_s24 = scalar_lea.vmem %s1450_s11, 32 }
  0x4a   : > { %p1132_p13 = scmp.ne.s32.totalorder %s1450_s11, %s1131_s28  ;;  %p1139_p10 = scmp.lt.s32.totalorder %s1450_s11, %s1450_s11 }
  0x4b   : > { %p1140_p11 = scmp.lt.s32.totalorder %s1138_s24, %s1131_s28 }
  0x4c   : > { %p1134_p4 = pnand %p1132_p13, %p1092_p6 }
  0x4d   : > { %p1141_p1 = por %p1140_p11, %p1139_p10 }
  0x4e   : > { %p1135_p5 = pneg %p1134_p4 }
  0x50   : > { %p1142_p0 = pnand %p1141_p1, %p1135_p5 }
  0x52   : > { %1145 = shalt.err (!%p1142_p0)
}
  0x53   : > { %1010 = dma.hbm_to_vmem [thread:$0]  (!%p1446_p2), %s1763_s5, 16, %s1450_s11, [#allocation10]  }
  0x54   : > { %s42_s21 = sadd.s32 1, %s1296_s17  ;;  %s1502_s27 = sand.u32 1, %s1288_s15  }
  0x55   : > { %p44_p6 = scmp.ge.s32.totalorder %s42_s21, 2  ;;  %s931_s12 = sshll.u32 %s1502_s27, 6 }
  0x56   : > { %s947_s22 = sshll.u32 %s1296_s17, 10  ;;  %s1765_s0 = sld [smem:[#allocation22_spill]] }
  0x57   : > { %s1790_s21 = smov (%p44_p6, %s42_s21), 0  ;;  %s352_s28 = scalar_lea.vmem [#allocation3], %s931_s12 }
  0x58   : > { %1764 = sst [smem:[#allocation20_spill]] %s1790_s21  ;;  %s46_s11 = ssub.s32 %s1296_s17, %s1790_s21 }
  0x59   : > { %s361_s24 = sshll.u32 %s352_s28, 4  ;;  %p49_p2 = scmp.eq.s32.totalorder %s46_s11, 0  ;;  %s1515_s24 = int_to_ptr.vmem [resolvable:$true] %s361_s24 }
  0x5a   : > { %s1766_s20 = sadd.s32 1, %s1288_s15  ;;  %s349_s3 = scalar_lea.sflag [#allocation4], %s1502_s27 }
  0x5b   : > { %s1520_s13 = scalar_select %p49_p2, %s1288_s15, %s1766_s20  }
  0x5c   : > { %s1511_s25 = scalar_lea.hbm %s1765_s0, %s947_s22  ;;  %p1768_p7 = scmp.ne.s32.totalorder %s1760_s29, 0 }
  0x5d   : > { %1767 = sst [smem:[#allocation21_spill]] %s1520_s13  ;;  %s1146_s5 = scalar_lea.hbm %s1511_s25, 1024 }
  0x5e   : > { %p1147_p3 = scmp.ne.s32.totalorder %s1511_s25, %s1146_s5  ;;  %p1148_p8 = pneg %p1768_p7 }
  0x5f   : > { %s1151_s12 = scalar_lea.hbm %s1765_s0, 2048  ;;  %p1152_p13 = scmp.lt.u32.totalorder %s1511_s25, %s1765_s0 }
  0x60   : > { %p1149_p9 = pnand %p1148_p8, %p1147_p3  ;;  %p1153_p4 = scmp.lt.u32.totalorder %s1151_s12, %s1146_s5 }
  0x61   : > { %p1155_p10 = scmp.lt.u32.totalorder %s1146_s5, %s1511_s25 }
  0x62   : > { %p1150_p12 = pneg %p1149_p9  ;;  %p1154_p5 = por %p1153_p4, %p1152_p13 }
  0x64   : > { %p1156_p11 = por %p1155_p10, %p1154_p5 }
  0x66   : > { %p1157_p1 = pnand %p1156_p11, %p1150_p12 }
  0x68   : > { %1160 = shalt.err (!%p1157_p1)
}
  0x69   : > { %s1161_s28 = scalar_lea.vmem %s1515_s24, 1024  ;;  %s1304_s20 = smov [#allocation3]  }
  0x6a   : > { %p1162_p0 = scmp.ne.s32.totalorder %s1515_s24, %s1161_s28  ;;  %s1166_s22 = sshll.u32 %s1304_s20, 4  ;;  %s1167_s22 = int_to_ptr.vmem [resolvable:$false] %s1166_s22 }
  0x6b   : > { %s1168_s30 = scalar_lea.vmem %s1167_s22, 2048  ;;  %p1169_p3 = scmp.lt.s32.totalorder %s1515_s24, %s1167_s22 }
  0x6c   : > { %p1164_p6 = pnand %p1162_p0, %p1148_p8  ;;  %p1170_p9 = scmp.lt.s32.totalorder %s1168_s30, %s1161_s28 }
  0x6e   : > { %p1165_p2 = pneg %p1164_p6  ;;  %p1171_p13 = por %p1170_p9, %p1169_p3 }
  0x70   : > { %p1172_p4 = pnand %p1171_p13, %p1165_p2 }
  0x72   : > { %1175 = shalt.err (!%p1172_p4)
}
  0x73   : > { %s1305_s5 = smov 256   ;;  %s1306_s12 = smov 16  }
  0x74   : > { %1014 = dma.hbm_to_vmem [thread:$0]  (!%p1768_p7), %s1511_s25, 1024, %s1515_s24, %s349_s3, %s1305_s5, %s1305_s5, %s1306_s12  }
  0x75   : > { %s371_s10 = sand.u32 1, %s1300_s18   ;;  %s934_s11 = sshll.u32 %s1296_s17, 4 }
  0x76   : > { %s1555_s22 = scalar_lea.hbm %s1727_s1, %s934_s11  ;;  %s374_s30 = scalar_lea.vmem [#allocation6], %s1502_s27 }
  0x77   : > { %s381_s0 = sshll.u32 %s374_s30, 4  ;;  %s372_s21 = scalar_lea.sflag [#allocation7], %s371_s10  ;;  %s382_s0 = int_to_ptr.vmem [resolvable:$true] %s381_s0 }
  0x78   : > { %s1176_s13 = scalar_lea.hbm %s1555_s22, 16  ;;  %s1181_s24 = scalar_lea.hbm %s1727_s1, 32 }
  0x79   : > { %p1177_p12 = scmp.ne.s32.totalorder %s1555_s22, %s1176_s13  ;;  %p1182_p11 = scmp.lt.u32.totalorder %s1555_s22, %s1727_s1 }
  0x7a   : > { %p1183_p1 = scmp.lt.u32.totalorder %s1181_s24, %s1176_s13  ;;  %p1185_p6 = scmp.lt.u32.totalorder %s1176_s13, %s1555_s22 }
  0x7b   : > { %p1179_p5 = pnand %p1177_p12, %p1148_p8 }
  0x7c   : > { %p1184_p0 = por %p1183_p1, %p1182_p11 }
  0x7d   : > { %p1180_p10 = pneg %p1179_p5 }
  0x7e   : > { %p1186_p2 = por %p1185_p6, %p1184_p0 }
  0x80   : > { %p1187_p3 = pnand %p1186_p2, %p1180_p10 }
  0x82   : > { %1190 = shalt.err (!%p1187_p3)
}
  0x83   : > { %s1191_s27 = scalar_lea.vmem %s382_s0, 16  ;;  %s1307_s10 = smov [#allocation6]  }
  0x84   : > { %p1192_p9 = scmp.ne.s32.totalorder %s382_s0, %s1191_s27  ;;  %s1196_s11 = sshll.u32 %s1307_s10, 4  ;;  %s1197_s11 = int_to_ptr.vmem [resolvable:$false] %s1196_s11 }
  0x85   : > { %s1198_s20 = scalar_lea.vmem %s1197_s11, 32  ;;  %p1199_p12 = scmp.lt.s32.totalorder %s382_s0, %s1197_s11 }
  0x86   : > { %p1194_p13 = pnand %p1192_p9, %p1148_p8  ;;  %p1200_p5 = scmp.lt.s32.totalorder %s1198_s20, %s1191_s27 }
  0x88   : > { %p1195_p4 = pneg %p1194_p13  ;;  %p1201_p1 = por %p1200_p5, %p1199_p12 }
  0x8a   : > { %p1202_p11 = pnand %p1201_p1, %p1195_p4 }
  0x8c   : > { %1205 = shalt.err (!%p1202_p11)
}
  0x8d   : > { %1017 = dma.hbm_to_vmem [thread:$0]  (!%p1768_p7), %s1555_s22, 16, %s382_s0, %s372_s21  }
  0x8e   : > { %p1769_p10 = scmp.ne.s32.totalorder %s1759_s26, 0 }
  0x8f   : > { %s1580_s13 = sand.u32 (!%p1769_p10), 1, %s1284_s14   ;;  %p1770_p8 = scmp.ne.s32.totalorder (!%p1769_p10), %s1754_s23, 0 }
  0x90   : > { %390 = sbr.rel (%p1769_p10) target bundleno = 951 (0x3b7), region = 60  ;;  %s936_s28 = sshll.u32 (!%p1769_p10), %s1580_s13, 6 }
  0x91   : > { %s393_s30 = scalar_lea.sflag (!%p1769_p10), [#allocation4], %s1580_s13  ;;  %s1584_s3 = scalar_lea.vmem (!%p1769_p10), [#allocation3], %s936_s28 }
  0x97   : > { %1259 = dma.done.wait (%p1770_p8), %s393_s30, 1024  }
  0x98   : > { %1261 = vsyncadd (%p1770_p8), %s393_s30, 4294966272  ;;  %s401_s0 = sand.u32 1, %s1399_s19   ;;  %s404_s29 = scalar_lea.vmem [#allocation6], %s1580_s13 }
  0x99   : > { %s402_s26 = scalar_lea.sflag [#allocation7], %s401_s0 }
  0x9a   : > { %1263 = dma.done.wait (%p1770_p8), %s402_s26, 16  }
  0x9b   : > { %1265 = vsyncadd (%p1770_p8), %s402_s26, 4294967280  ;;  %p1771_p7 = scmp.eq.s32.totalorder %s1399_s19, 0 }
  0x9d   : > { %1267 = dma.done.wait (%p1771_p7), [#allocation7], 16   ;;  %p1772_p0 = pmov %p1771_p7 }
  0x9f   : > { %1269 = vsyncadd (%p1772_p0), [#allocation7], 4294967280  ;;  %p1773_p6 = pmov %p1772_p0 }
  0xa0   : > { %p1774_p2 = pmov %p1772_p0 }
  0xa1   : > { %1271 = dma.done.wait (%p1773_p6), [#allocation10], 16  }
  0xa2   : > { %1273 = vsyncadd (%p1774_p2), [#allocation10], 4294967280  ;;  %v1308_v0 = vmov 0.0|0.0   ;;  %vm1309_vm0 = vmmov 0   ;;  %v1310_v1 = vmov 0.0   ;;  %vm457_vm1 = vcmask 7168  }
  0xa3   : > { %981 = vmatprep.subr.bf16.mxu0 %v1308_v0  ;;  %962 = vmatprep.mubr.msk.f32.mxu0 %vm1309_vm0, %v1310_v1  ;;  %458 = vst.msk [vmem:[#allocation2] sm:$0xff] %vm457_vm1, %v1310_v1  ;;  %459 = vst.msk [vmem:[#allocation2 + $0x8] sm:$0xff] %vm457_vm1, %v1310_v1  ;;  %v466_v2 = vld [vmem:[%s1584_s3] sm:$0xff]  ;;  %v467_v3 = vld [vmem:[%s1584_s3 + $0x8] sm:$0xff]  ;;  %vm554_vm2 = vcmask 130048   ;;  %v1311_v18 = vmov 0  }
  0xa4   : > { %460 = vst.msk [vmem:[#allocation2 + $0x10] sm:$0xff] %vm457_vm1, %v1310_v1  ;;  %461 = vst.msk [vmem:[#allocation2 + $0x18] sm:$0xff] %vm457_vm1, %v1310_v1  ;;  %984 = vmatprep.subr.bf16.mxu1 %v1308_v0  ;;  %973 = vmatprep.mubr.msk.f32.mxu1 %vm1309_vm0, %v1310_v1  ;;  %v468_v4 = vld [vmem:[%s1584_s3 + $0x10] sm:$0xff]  ;;  %v474_v5 = vadd.f32 %v467_v3, %v466_v2  ;;  %v469_v6 = vld [vmem:[%s1584_s3 + $0x18] sm:$0xff]  ;;  %vm534_vm3 = vcmask 261120   ;;  %vm714_vm4 = vcmask 1041408  }
  0xa5   : > { %v470_v7 = vld [vmem:[%s1584_s3 + $0x20] sm:$0xff]  ;;  %v471_v8 = vld [vmem:[%s1584_s3 + $0x28] sm:$0xff]  ;;  %v472_v10 = vld [vmem:[%s1584_s3 + $0x30] sm:$0xff]  ;;  %v477_v13 = vadd.f32 %v469_v6, %v468_v4  ;;  %1084 = vset.pattern.permute.xlu0 %v1311_v18  ;;  %1085 = vset.pattern.permute.xlu1 %v1311_v18  ;;  %vm710_vm5 = vcmask 15360   ;;  %s1775_s27 = sld [smem:[#allocation18_spill]]  ;;  %s944_s10 = sshll.u32 %s1292_s16, 4 }
  0xa6   : > { %v480_v9 = vadd.f32 %v471_v8, %v470_v7  ;;  %v473_v11 = vld [vmem:[%s1584_s3 + $0x38] sm:$0xff]  ;;  %v551_v12 = vld [vmem:[%s1730_s4] sm:$0xff]  ;;  %475 = vadd.xlane.f32.xlu0 %v474_v5  ;;  %v552_v14 = vld [vmem:[%s1730_s4 + $0x8] sm:$0xff]  ;;  %s451_s11 = scalar_lea.vmem [#allocation11], %s1580_s13  ;;  %vm794_vm6 = vcmask 253952   ;;  %s1776_s3 = sld [smem:[#allocation25_spill]] }
  0xa7   : > { %v483_v15 = vadd.f32 %v473_v11, %v472_v10  ;;  %v982_v16 = vpack.c.bf16 %v552_v14, %v551_v12  ;;  %v550_v17 = vld [vmem:[%s404_s29] sm:$0x1]  ;;  %v630_v40 = vld [vmem:[%s1732_s6 + $0x8] sm:$0xff]  ;;  %v631_v42 = vld [vmem:[%s1732_s6 + $0x10] sm:$0xff]  ;;  %s809_s20 = sshll.u32 %s451_s11, 4  ;;  %s797_s26 = scalar_lea.sflag [#allocation5], %s1580_s13  ;;  %s1679_s20 = int_to_ptr.vmem [resolvable:$true] %s809_s20 }
  0xa8   : > { %481 = vadd.xlane.f32.xlu1 %v480_v9  ;;  %v629_v39 = vld [vmem:[%s1732_s6] sm:$0xff]  ;;  %v632_v43 = vld [vmem:[%s1732_s6 + $0x18] sm:$0xff]  ;;  %v507_v47 = vld [vmem:[%s1728_s2 + $0x8] sm:$0xff]  ;;  %s1206_s29 = scalar_lea.vmem %s1679_s20, 16  ;;  %s1312_s16 = smov [#allocation11]  }
  0xa9   : > { %983 = vmatpush3.bf16.msra.mxu0 %v982_v16  ;;  %v985_v41 = vpack.c.bf16 %v630_v40, %v629_v39  ;;  %v988_v44 = vpack.c.bf16 %v632_v43, %v631_v42  ;;  %v506_v48 = vld [vmem:[%s1728_s2] sm:$0xff]  ;;  %v508_v52 = vld [vmem:[%s1728_s2 + $0x10] sm:$0xff]  ;;  %v509_v57 = vld [vmem:[%s1728_s2 + $0x18] sm:$0xff]  ;;  %p1207_p3 = scmp.ne.s32.totalorder %s1679_s20, %s1206_s29  ;;  %s1210_s19 = sshll.u32 %s1312_s16, 4  ;;  %s1211_s19 = int_to_ptr.vmem [resolvable:$false] %s1210_s19 }
  0xaa   : > { %478 = vadd.xlane.f32.xlu0 %v477_v13  ;;  %976 = vmatprep.subr.mxu0 %v1310_v1  ;;  %v462_v19 = vld [vmem:[#allocation2] sm:$0xff]  ;;  %v463_v24 = vld [vmem:[#allocation2 + $0x8] sm:$0xff]  ;;  %s1212_s23 = scalar_lea.vmem %s1211_s19, 32  ;;  %p1213_p12 = scmp.lt.s32.totalorder %s1679_s20, %s1211_s19 }
  0xab   : > { %v464_v20 = vld [vmem:[#allocation2 + $0x10] sm:$0xff]  ;;  %v465_v26 = vld [vmem:[#allocation2 + $0x18] sm:$0xff]  ;;  %986 = vmatpush3.bf16.msra.mxu1 %v985_v41  ;;  %v553_v6 = vld [vmem:[#allocation9] sm:$0x1]  ;;  %p1777_p9 = scmp.ne.s32.totalorder %s1775_s27, 0  ;;  %p1214_p5 = scmp.lt.s32.totalorder %s1212_s23, %s1206_s29 }
  0xac   : > { %484 = vadd.xlane.f32.xlu1 %v483_v15  ;;  %963 = vmatmul.mubr.msk.f32.vlgmr.msra.gmra.mrb[0].mxu0 %vm554_vm2, %v550_v17  ;;  %v548_v8 = vld [vmem:[#allocation8] sm:$0x1]  ;;  %v708_v13 = vld [vmem:[%s1734_s8] sm:$0x3]  ;;  %s1677_s0 = scalar_lea.hbm %s1776_s3, %s944_s10 }
  0xad   : > { %978 = vmatprep.mubr.msk.f32.mxu0 %vm1309_vm0, %v1310_v1  ;;  %987 = vmatprep.subr.bf16.mxu1 %v1308_v0  ;;  %v633_v14 = vld [vmem:[%s1733_s7] sm:$0x1]  ;;  %p1208_p13 = pnand %p1207_p3, %p1777_p9  ;;  %p1215_p1 = por %p1214_p5, %p1213_p12 }
  0xae   : > { %977 = vmatpush3.msk.msra.mxu0 %vm714_vm4, %v708_v13 }
  0xaf   : > { %989 = vmatpush3.bf16.msra.mxu1 %v988_v44  ;;  %p1209_p4 = pneg %p1208_p13 }
  0xb1   : > { %p1216_p11 = pnand %p1215_p1, %p1209_p4 }
 0x133   : > { %v476_v21 = vpop.xlane.xlu0 %475 }
 0x134   : > { %v486_v22 = vadd.f32 %v476_v21, %v462_v19  ;;  %v709_v19 = vld [vmem:[%s1735_s9] sm:$0x1] }
 0x135   : > { %v482_v23 = vpop.xlane.xlu1 %481 }
 0x136   : > { %v488_v25 = vadd.f32 %v482_v23, %v464_v20  ;;  %491 = vst.msk [vmem:[#allocation2] sm:$0xff] %vm457_vm1, %v486_v22 }
 0x137   : > { %v479_v27 = vpop.xlane.xlu0 %478 }
 0x138   : > { %493 = vst.msk [vmem:[#allocation2 + $0x10] sm:$0xff] %vm457_vm1, %v488_v25  ;;  %v487_v28 = vadd.f32 %v479_v27, %v463_v24 }
 0x139   : > { %v485_v29 = vpop.xlane.xlu1 %484 }
 0x13a   : > { %v489_v30 = vadd.f32 %v485_v29, %v465_v26  ;;  %492 = vst.msk [vmem:[#allocation2 + $0x8] sm:$0xff] %vm457_vm1, %v487_v28 }
 0x13c   : > { %494 = vst.msk [vmem:[#allocation2 + $0x18] sm:$0xff] %vm457_vm1, %v489_v30 }
 0x13d   : > { %v498_v31 = vld [vmem:[#allocation2] sm:$0xff] }
 0x13e   : > { %v502_v32 = vmul.f32 0.00390625, %v498_v31 }
 0x13f   : > { %v500_v34 = vld [vmem:[#allocation2 + $0x10] sm:$0xff] }
 0x140   : > { %512 = vperm.xlu0 %1084, %v502_v32   ;;  %v504_v36 = vmul.f32 0.00390625, %v500_v34 }
 0x141   : > { %v499_v33 = vld [vmem:[#allocation2 + $0x8] sm:$0xff] }
 0x142   : > { %v503_v35 = vmul.f32 0.00390625, %v499_v33 }
 0x143   : > { %v501_v37 = vld [vmem:[#allocation2 + $0x18] sm:$0xff] }
 0x144   : > { %517 = vperm.xlu1 %1085, %v503_v35   ;;  %v505_v38 = vmul.f32 0.00390625, %v501_v37 }
 0x148   : > { %522 = vperm.xlu1 %1085, %v504_v36  }
 0x14c   : > { %527 = vperm.xlu1 %1085, %v505_v38  }
 0x17f   : > { %v624_v45 = vpop.f32.mrb[0].mxu0 }
 0x180   : > { %v964_v46 = vpop.f32.mrb[1].mxu0  ;;  %v625_v10 = vadd.f32 %v624_v45, %v553_v6 }
 0x1bf   : > { %v513_v49 = vpop.permute.xlu0 %512 }
 0x1c0   : > { %v530_v53 = vmul.f32 %v513_v49, %v506_v48 }
 0x1c2   : > { %v535_v58 = vsel %vm534_vm3, %v530_v53, 0.0 }
 0x1c3   : > { %v518_v50 = vpop.permute.xlu1 %517 }
 0x1c4   : > { %v531_v51 = vmul.f32 %v518_v50, %v507_v47 }
 0x1c6   : > { %v536_v55 = vsel %vm534_vm3, %v531_v51, 0.0 }
 0x1c7   : > { %v523_v54 = vpop.permute.xlu1 %522  ;;  %v537_v60 = vadd.f32 %v536_v55, %v535_v58 }
 0x1c8   : > { %v532_v56 = vmul.f32 %v523_v54, %v508_v52 }
 0x1ca   : > { %v538_v59 = vsel %vm534_vm3, %v532_v56, 0.0 }
 0x1cb   : > { %v528_v61 = vpop.permute.xlu1 %527  ;;  %v539_v63 = vadd.f32 %v538_v59, %v537_v60 }
 0x1cc   : > { %v533_v62 = vmul.f32 %v528_v61, %v509_v57 }
 0x1ce   : > { %v540_v0 = vsel %vm534_vm3, %v533_v62, 0.0 }
 0x1cf   : > { %v541_v1 = vadd.f32 %v540_v0, %v539_v63 }
 0x1d1   : > { %v542_v2 = vrot.slane %v541_v1, 4 }
 0x1d3   : > { %v543_v3 = vadd.f32 %v542_v2, %v541_v1 }
 0x1d5   : > { %v544_v4 = vrot.slane %v543_v3, 2 }
 0x1d7   : > { %v545_v5 = vadd.f32 %v544_v4, %v543_v3 }
 0x1d9   : > { %v546_v7 = vrot.slane %v545_v5, 1 }
 0x1db   : > { %v547_v9 = vadd.f32 %v546_v7, %v545_v5 }
 0x1dd   : > { %v549_v11 = vadd.f32 %v548_v8, %v547_v9 }
 0x1df   : > { %v628_v12 = vadd.f32 %v625_v10, %v549_v11 }
 0x1e1   : > { %974 = vmatmul.mubr.msk.f32.vlgmr.msra.gmra.mrb[0].mxu1 %vm534_vm3, %v628_v12 }
 0x2b4   : > { %v703_v15 = vpop.f32.mrb[0].mxu1 }
 0x2b5   : > { %v704_v16 = vadd.f32 %v703_v15, %v633_v14  ;;  %v975_v17 = vpop.f32.mrb[1].mxu1 }
 0x2b7   : > { %v707_v18 = vmax.f32 %v704_v16, 0.0 }
 0x2b9   : > { %979 = vmatmul.mubr.msk.f32.vlgmr.msra.gmra.mrb[2].mxu0 %vm710_vm5, %v707_v18 }
 0x38c   : > { %v784_v20 = vpop.f32.mrb[2].mxu0 }
 0x38d   : > { %v785_v21 = vadd.f32 %v784_v20, %v709_v19  ;;  %v980_v22 = vpop.f32.mrb[3].mxu0 }
 0x38f   : > { %v943_v23 = vmul.f32 -1.442695, %v785_v21 }
 0x391   : > { %1086 = vpow2.f32 %v943_v23 }
 0x39b   : > { %v1087_v24 = vpop.eup %1086 }
 0x39c   : > { %v791_v25 = vadd.f32 1.0, %v1087_v24 }
 0x39e   : > { %1088 = vrcp.f32 %v791_v25 }
 0x3a8   : > { %v1089_v26 = vpop.eup %1088 }
 0x3a9   : > { %795 = vst.msk [vmem:[%s451_s11] sm:$0x1] %vm794_vm6, %v1089_v26 }
 0x3aa   : > { %1219 = shalt.err (!%p1216_p11)
}
 0x3ab   : > { %s1220_s13 = scalar_lea.hbm %s1677_s0, 16  ;;  %s1224_s25 = scalar_lea.hbm %s1776_s3, 32 }
 0x3ac   : > { %p1221_p10 = scmp.ne.s32.totalorder %s1677_s0, %s1220_s13  ;;  %p1225_p0 = scmp.lt.u32.totalorder %s1677_s0, %s1776_s3 }
 0x3ad   : > { %p1226_p6 = scmp.lt.u32.totalorder %s1224_s25, %s1220_s13  ;;  %p1228_p3 = scmp.lt.u32.totalorder %s1220_s13, %s1677_s0 }
 0x3ae   : > { %p1222_p8 = pnand %p1221_p10, %p1777_p9 }
 0x3af   : > { %p1227_p2 = por %p1226_p6, %p1225_p0 }
 0x3b0   : > { %p1223_p7 = pneg %p1222_p8 }
 0x3b1   : > { %p1229_p13 = por %p1228_p3, %p1227_p2 }
 0x3b3   : > { %p1230_p4 = pnand %p1229_p13, %p1223_p7 }
 0x3b5   : > { %1233 = shalt.err (!%p1230_p4)
}
 0x3b6   : > { %1002 = dma.vmem_to_hbm [thread:$0]  (%p1777_p9), %s1679_s20, 16, %s1677_s0, %s797_s26  }
 0x3b7 PF: > { %s1778_s12 = sld [smem:[#allocation17_spill]]  ;;  %s1779_s10 = sld [smem:[#allocation19_spill]] }
 0x3b8   : > { %p1781_p5 = scmp.ge.s32.totalorder %s1300_s18, 2 }
 0x3bd   : > { %s821_s11 = sand.u32 1, %s1778_s12   ;;  %p1780_p12 = scmp.ne.s32.totalorder %s1779_s10, 0 }
 0x3be   : > { %s822_s28 = scalar_lea.sflag [#allocation5], %s821_s11 }
 0x3bf   : > { %p1019_p1 = pnand %p1781_p5, %p1780_p12 }
 0x3c1   : > { %1275 = dma.done.wait (!%p1019_p1), %s822_s28, 16  }
 0x3c2   : > { %1277 = vsyncadd (!%p1019_p1), %s822_s28, 4294967280  ;;  %s30_s18 = sadd.s32 1, %s1300_s18   ;;  %s1782_s27 = sld [smem:[#allocation21_spill]] }
 0x3c3   : > { %p27_p11 = scmp.ge.s32.totalorder %s30_s18, 4   ;;  %s1783_s30 = sld [smem:[#allocation20_spill]] }
 0x3c4   : > { %s1784_s13 = smov %s1284_s14  ;;  %s1785_s14 = smov %s1288_s15 }
 0x3c5   : > { %s1787_s16 = smov %s1296_s17  ;;  %29 = sbr.rel (!%p27_p11) target bundleno = 14 (0xe), region = 134 }
 0x3c8   : > { %s1786_s15 = smov %s1782_s27 }
 0x3c9   : > { %s1788_s17 = smov %s1783_s30 }
 0x3cc   :  { %826 = vsyncpa [#allocation4], 1 }
 0x3cd   :  { %828 = vsyncpa [#allocation4 + $0x1], 1 }
 0x3ce   :  { %829 = vsyncpa [#allocation7], 1 }
 0x3cf   :  { %831 = vsyncpa [#allocation7 + $0x1], 1 }
 0x3d0   :  { %832 = vsyncpa [#allocation10], 1 }
 0x3d1   :  { %833 = vsyncpa [#allocation5], 1 }
 0x3d2   :  { %835 = vsyncpa [#allocation5 + $0x1], 1 }

</bundles_post_ra>
